<compile_context>
chip_gen: v5e
topology: v5e:2x2
jax: 0.10.0
libtpu: 0.0.40
codegen_flags: <defaults>
</compile_context>

<pallas_src>
import jax
import jax.numpy as jnp
from jax.experimental import pallas as pl
from jax.experimental.pallas import tpu as pltpu


# ----------------------------------------------------------------------------- kernel


def _lora_linear_kernel(x_ref, w_ref, a_ref, b_ref, bias_ref, o_ref,
                        acc_ref, xa_ref, xac_ref):
    """One (tm, tn) output tile of y = x @ W + bias + (x @ A) @ (scaling*B).

    Grid: (i tokens [parallel], j out-features [arbitrary], k reduction
    [arbitrary, innermost]).  Weights arrive pre-transposed (K, tn) / (K, r) /
    (r, tn), so all three matmuls hit the MXU with no in-kernel transposes.

    xa (= x @ A, (tm, r) f32) is accumulated over k only during the j == 0
    sweep and cast once to the operand dtype (xac); it is then reused for all
    later j of the same token tile.  Correctness requires j and k to stay
    sequential ("arbitrary") with k innermost — do not reorder the grid.
    """
    j = pl.program_id(1)
    k = pl.program_id(2)
    nk = pl.num_programs(2)

    @pl.when(k == 0)
    def _():
        acc_ref[...] = jnp.zeros_like(acc_ref)

    @pl.when(jnp.logical_and(j == 0, k == 0))
    def _():
        xa_ref[...] = jnp.zeros_like(xa_ref)

    acc_ref[...] += jnp.dot(x_ref[...], w_ref[...],
                            preferred_element_type=jnp.float32)

    @pl.when(j == 0)
    def _():
        xa_ref[...] += jnp.dot(x_ref[...], a_ref[...],
                               preferred_element_type=jnp.float32)

    @pl.when(jnp.logical_and(j == 0, k == nk - 1))
    def _():
        xac_ref[...] = xa_ref[...].astype(xac_ref.dtype)

    @pl.when(k == nk - 1)
    def _():
        lora = jnp.dot(xac_ref[...], b_ref[...],
                       preferred_element_type=jnp.float32)
        o_ref[...] = (acc_ref[...] + bias_ref[...] + lora).astype(o_ref.dtype)


# ------------------------------------------------------------------- param preparation


def prepare_lora_params(w, lora_A, lora_B, bias, scaling, *, compute_dtype=jnp.bfloat16):
    """One-time re-layout of the LoRA-adapted linear parameters.

    Do this at parameter-load time, NOT per forward call: it materializes the
    transposed (K, N) weight / (K, r) A / scaling-folded (r, N) B / (1, N) f32
    bias in MXU-friendly orientation and (by default) bf16 operand dtype.
    """
    w = jnp.asarray(w)
    cd = compute_dtype if compute_dtype is not None else w.dtype
    wt = w.T.astype(cd)                                                         # (K, N)
    at = jnp.asarray(lora_A).T.astype(cd)                                       # (K, r)
    bt = (jnp.asarray(lora_B).astype(jnp.float32).T
          * jnp.float32(scaling)).astype(cd)                                    # (r, N)
    bias2d = jnp.asarray(bias).astype(jnp.float32).reshape(1, -1)               # (1, N)
    return {"wt": wt, "at": at, "bt": bt, "bias2d": bias2d, "compute_dtype": cd}


# ---------------------------------------------------------------------------- wrapper


def _round_up(v, m):
    return ((v + m - 1) // m) * m


def _pick_tk(K, tk_max):
    """Full-K blocks when small; otherwise a clean divisor (no ragged K tiles,
    which would contaminate in-bounds results)."""
    if K <= tk_max:
        return K
    for cand in (2048, 1024, 512, 256, 128):
        if cand <= tk_max and K % cand == 0:
            return cand
    return K  # no clean divisor: fall back to full-K blocks (correct, more VMEM)


_VMEM_BLOCK_BUDGET = 40 << 20  # conservative: fits v5e/v6e and v7x's 64 MiB per TC


def lora_linear(x, prep, *, tm=512, tn=512, tk_max=2048):
    """Fused LoRA linear on pre-layouted params: y = x @ W + bias + (x@A) @ (s*B).

    x: (M, K).  prep: output of prepare_lora_params.  Returns (M, N) in x.dtype.
    """
    M, K = x.shape
    wt, at, bt, bias2d = prep["wt"], prep["at"], prep["bt"], prep["bias2d"]
    assert wt.shape[0] == K and at.shape[0] == K
    N = wt.shape[1]
    r = at.shape[1]
    out_dtype = x.dtype
    cd = prep["compute_dtype"]
    x = x.astype(cd)

    dsz = jnp.dtype(cd).itemsize
    osz = jnp.dtype(out_dtype).itemsize

    # --- tile selection (lane-dense tn, sublane-aligned tm, VMEM-budgeted) ---
    tm = max(8, min(tm, _round_up(M, 8)))
    tn = max(128, min(tn, _round_up(N, 128)))
    tk = _pick_tk(K, tk_max)

    def footprint(tm_, tn_, tk_):
        blocks = 2 * (tm_ * tk_ * dsz      # x tile (double buffered)
                      + tk_ * tn_ * dsz    # W tile
                      + tk_ * r * dsz      # A tile
                      + r * tn_ * dsz      # B tile
                      + tn_ * 4            # bias tile
                      + tm_ * tn_ * osz)   # out tile
        scratch = tm_ * tn_ * 4 + tm_ * r * 4 + tm_ * r * dsz
        return blocks + scratch

    while footprint(tm, tn, tk) > _VMEM_BLOCK_BUDGET and tn > 128:
        tn = max(128, ((tn // 2) // 128) * 128)
    while footprint(tm, tn, tk) > _VMEM_BLOCK_BUDGET and tm > 64:
        tm = max(8, ((tm // 2) // 8) * 8)

    fp = footprint(tm, tn, tk)
    vmem_limit = int(min(100 << 20, max(32 << 20, fp * 1.3 + (4 << 20))))

    grid = (pl.cdiv(M, tm), pl.cdiv(N, tn), pl.cdiv(K, tk))
    gi, gj, gk = grid

    # Streaming-aware byte estimate: W/B/bias re-read per token tile, x re-read
    # per out-feature tile, A per (i, j) sweep.
    cost = pl.CostEstimate(
        flops=2 * M * N * K + 2 * M * K * r + 2 * M * r * N,
        transcendentals=0,
        bytes_accessed=int(gj * M * K * dsz
                           + gi * K * N * dsz
                           + gi * gj * K * r * dsz
                           + gi * r * N * dsz
                           + gi * N * 4
                           + M * N * osz),
    )

    return pl.pallas_call(
        _lora_linear_kernel,
        out_shape=jax.ShapeDtypeStruct((M, N), out_dtype),
        grid_spec=pltpu.PrefetchScalarGridSpec(
            num_scalar_prefetch=0,
            grid=grid,
            in_specs=[
                pl.BlockSpec((tm, tk), lambda i, j, k: (i, k)),   # activations
                pl.BlockSpec((tk, tn), lambda i, j, k: (k, j)),   # base weight (K, N)
                pl.BlockSpec((tk, r), lambda i, j, k: (k, 0)),    # LoRA A (K, r)
                pl.BlockSpec((r, tn), lambda i, j, k: (0, j)),    # scaled LoRA B (r, N)
                pl.BlockSpec((1, tn), lambda i, j, k: (0, j)),    # bias (1, N) f32
            ],
            out_specs=pl.BlockSpec((tm, tn), lambda i, j, k: (i, j)),
            scratch_shapes=[
                pltpu.VMEM((tm, tn), jnp.float32),   # base matmul accumulator
                pltpu.VMEM((tm, r), jnp.float32),    # x @ A accumulator
                pltpu.VMEM((tm, r), cd),             # x @ A, cast once to operand dtype
            ],
        ),
        compiler_params=pltpu.CompilerParams(
            # j and k must stay sequential (xa scratch reuse + accumulation);
            # i (token tiles) is safe to shard across TensorCores.
            dimension_semantics=("parallel", "arbitrary", "arbitrary"),
            vmem_limit_bytes=vmem_limit,
        ),
        cost_estimate=cost,
    )(x, wt, at, bt, bias2d)


def peft_model_wrapper_forward(x, prepared_params):
    """Mirrors PeftModelWrapper.forward: pure delegation to the wrapped PEFT
    (LoRA) base model's forward, whose numeric hot path is the fused
    LoRA-adapted linear above.  x: (batch, seq, hidden) -> (batch, seq, out)."""
    B, S, H = x.shape
    y2d = lora_linear(x.reshape(B * S, H), prepared_params)
    return y2d.reshape(B, S, -1)


# ------------------------------------------------------------------------------- test


if __name__ == "__main__":
    # Small shapes consistent with a LoRA-adapted linear layer.
    batch, seq, hidden, out_features, rank = 2, 8, 32, 32, 8
    lora_alpha = 16.0
    scaling = lora_alpha / rank

    key = jax.random.PRNGKey(0)
    kx, kw, ka, kb, kbias = jax.random.split(key, 5)

    x = jax.random.normal(kx, (batch, seq, hidden), dtype=jnp.float32)
    w = jax.random.normal(kw, (out_features, hidden), dtype=jnp.float32) * 0.05
    bias = jax.random.normal(kbias, (out_features,), dtype=jnp.float32) * 0.01
    # PEFT default-inits B to zero; use nonzero B so the LoRA path is exercised.
    lora_A = jax.random.normal(ka, (rank, hidden), dtype=jnp.float32) * 0.1
    lora_B = jax.random.normal(kb, (out_features, rank), dtype=jnp.float32) * 0.1

    # Pure-JAX reference.
    x2d = x.reshape(batch * seq, hidden)
    ref = (x2d @ w.T + bias + scaling * ((x2d @ lora_A.T) @ lora_B.T))
    ref = ref.reshape(batch, seq, out_features)

    # Default path: bf16 MXU operands, f32 accumulation (params prepared once).
    prep_bf16 = prepare_lora_params(w, lora_A, lora_B, bias, scaling)
    y = jax.block_until_ready(peft_model_wrapper_forward(x, prep_bf16))
    assert y.shape == (batch, seq, out_features)
    assert jnp.allclose(y, ref, atol=5e-2, rtol=5e-2), "bf16 mismatch vs reference"

    # Explicit f32-operand path (tight tolerance).
    prep_f32 = prepare_lora_params(w, lora_A, lora_B, bias, scaling,
                                   compute_dtype=jnp.float32)
    y32 = jax.block_until_ready(peft_model_wrapper_forward(x, prep_f32))
    assert jnp.allclose(y32, ref, atol=1e-4, rtol=1e-4), "f32 mismatch vs reference"

    # Multi-tile grid (i=2, j=3, k=2) with ragged M and N edges: exercises the
    # K-axis accumulation, xa reuse across j, and masked edge stores.
    M2, K2, N2, r2 = 60, 256, 320, 8
    k2 = jax.random.PRNGKey(1)
    kx2, kw2, ka2, kb2, kbias2 = jax.random.split(k2, 5)
    x2 = jax.random.normal(kx2, (M2, K2), dtype=jnp.float32)
    w2 = jax.random.normal(kw2, (N2, K2), dtype=jnp.float32) * 0.05
    bias2 = jax.random.normal(kbias2, (N2,), dtype=jnp.float32) * 0.01
    A2 = jax.random.normal(ka2, (r2, K2), dtype=jnp.float32) * 0.1
    B2 = jax.random.normal(kb2, (N2, r2), dtype=jnp.float32) * 0.1
    prep2 = prepare_lora_params(w2, A2, B2, bias2, 2.0, compute_dtype=jnp.float32)
    y2 = jax.block_until_ready(lora_linear(x2, prep2, tm=32, tn=128, tk_max=128))
    ref2 = x2 @ w2.T + bias2 + 2.0 * ((x2 @ A2.T) @ B2.T)
    assert y2.shape == (M2, N2)
    assert jnp.allclose(y2, ref2, atol=1e-3, rtol=1e-3), "multi-tile mismatch"

    print("KERNEL_OK")
</pallas_src>

<mosaic_0001>
module attributes {stable_mosaic.version = 11 : i64} {
  func.func @_lora_linear_kernel(%arg0: i32, %arg1: i32, %arg2: i32, %arg3: memref<16x32xbf16, #tpu.memory_space<vmem>>, %arg4: memref<32x128xbf16, #tpu.memory_space<vmem>>, %arg5: memref<32x8xbf16, #tpu.memory_space<vmem>>, %arg6: memref<8x128xbf16, #tpu.memory_space<vmem>>, %arg7: memref<1x128xf32, #tpu.memory_space<vmem>>, %arg8: memref<16x128xf32, #tpu.memory_space<vmem>>, %arg9: memref<16x128xf32, #tpu.memory_space<vmem>>, %arg10: memref<16x8xf32, #tpu.memory_space<vmem>>, %arg11: memref<16x8xbf16, #tpu.memory_space<vmem>>) attributes {dimension_semantics = [#tpu.dimension_semantics<parallel>, #tpu.dimension_semantics<arbitrary>, #tpu.dimension_semantics<arbitrary>], iteration_bounds = array<i64: 1, 1, 1>, scalar_prefetch = 0 : i64, scratch_operands = 3 : i64, tpu.core_type = #tpu.core_type<tc>, window_params = [{transform_indices = @transform_0, window_bounds = array<i64: 16, 32>}, {transform_indices = @transform_1, window_bounds = array<i64: 32, 128>}, {transform_indices = @transform_2, window_bounds = array<i64: 32, 8>}, {transform_indices = @transform_3, window_bounds = array<i64: 8, 128>}, {transform_indices = @transform_4, window_bounds = array<i64: 1, 128>}, {transform_indices = @transform_5, window_bounds = array<i64: 16, 128>}]} {
    %c0_i32 = arith.constant 0 : i32
    %0 = arith.cmpi eq, %arg2, %c0_i32 : i32
    %1 = arith.extui %0 : i1 to i32
    %c0_i32_0 = arith.constant 0 : i32
    %2 = arith.cmpi ne, %1, %c0_i32_0 : i32
    scf.if %2 {
      %cst_18 = arith.constant 0.000000e+00 : f32
      %25 = vector.broadcast %cst_18 : f32 to vector<16x128xf32>
      %c0_19 = arith.constant 0 : index
      %c0_20 = arith.constant 0 : index
      %26 = vector.load %arg9[%c0_19, %c0_20] : memref<16x128xf32, #tpu.memory_space<vmem>>, vector<16x128xf32>
      tpu.vector_store %arg9[%c0_19, %c0_20], %25 {strides = array<i32>} : memref<16x128xf32, #tpu.memory_space<vmem>>, vector<16x128xf32>,
    } else {
    }
    %c0_i32_1 = arith.constant 0 : i32
    %3 = arith.cmpi eq, %arg1, %c0_i32_1 : i32
    %c0_i32_2 = arith.constant 0 : i32
    %4 = arith.cmpi eq, %arg2, %c0_i32_2 : i32
    %5 = arith.andi %3, %4 : i1
    %6 = arith.extui %5 : i1 to i32
    %c0_i32_3 = arith.constant 0 : i32
    %7 = arith.cmpi ne, %6, %c0_i32_3 : i32
    scf.if %7 {
      %cst_18 = arith.constant 0.000000e+00 : f32
      %25 = vector.broadcast %cst_18 : f32 to vector<16x8xf32>
      %c0_19 = arith.constant 0 : index
      %c0_20 = arith.constant 0 : index
      %26 = vector.load %arg10[%c0_19, %c0_20] : memref<16x8xf32, #tpu.memory_space<vmem>>, vector<16x8xf32>
      tpu.vector_store %arg10[%c0_19, %c0_20], %25 {strides = array<i32>} : memref<16x8xf32, #tpu.memory_space<vmem>>, vector<16x8xf32>,
    } else {
    }
    %c0 = arith.constant 0 : index
    %c0_4 = arith.constant 0 : index
    %8 = vector.load %arg9[%c0, %c0_4] : memref<16x128xf32, #tpu.memory_space<vmem>>, vector<16x128xf32>
    %c0_5 = arith.constant 0 : index
    %c0_6 = arith.constant 0 : index
    %9 = vector.load %arg3[%c0_5, %c0_6] : memref<16x32xbf16, #tpu.memory_space<vmem>>, vector<16x32xbf16>
    %c0_7 = arith.constant 0 : index
    %c0_8 = arith.constant 0 : index
    %10 = vector.load %arg4[%c0_7, %c0_8] : memref<32x128xbf16, #tpu.memory_space<vmem>>, vector<32x128xbf16>
    %cst = arith.constant dense<0.000000e+00> : vector<16x128xf32>
    %11 = tpu.matmul %9, %10, %cst {dimension_numbers = #tpu.dot_dimension_numbers<[1], [0], [0], [1], [0, 0, 1, 1], [], []>} : vector<16x32xbf16>, vector<32x128xbf16>, vector<16x128xf32> -> vector<16x128xf32>
    %12 = arith.addf %8, %11 : vector<16x128xf32>
    %c0_9 = arith.constant 0 : index
    %c0_10 = arith.constant 0 : index
    %13 = vector.load %arg9[%c0_9, %c0_10] : memref<16x128xf32, #tpu.memory_space<vmem>>, vector<16x128xf32>
    tpu.vector_store %arg9[%c0_9, %c0_10], %12 {strides = array<i32>} : memref<16x128xf32, #tpu.memory_space<vmem>>, vector<16x128xf32>,
    %c0_i32_11 = arith.constant 0 : i32
    %14 = arith.cmpi eq, %arg1, %c0_i32_11 : i32
    %15 = arith.extui %14 : i1 to i32
    %c0_i32_12 = arith.constant 0 : i32
    %16 = arith.cmpi ne, %15, %c0_i32_12 : i32
    scf.if %16 {
      %c0_18 = arith.constant 0 : index
      %c0_19 = arith.constant 0 : index
      %25 = vector.load %arg10[%c0_18, %c0_19] : memref<16x8xf32, #tpu.memory_space<vmem>>, vector<16x8xf32>
      %c0_20 = arith.constant 0 : index
      %c0_21 = arith.constant 0 : index
      %26 = vector.load %arg3[%c0_20, %c0_21] : memref<16x32xbf16, #tpu.memory_space<vmem>>, vector<16x32xbf16>
      %c0_22 = arith.constant 0 : index
      %c0_23 = arith.constant 0 : index
      %27 = vector.load %arg5[%c0_22, %c0_23] : memref<32x8xbf16, #tpu.memory_space<vmem>>, vector<32x8xbf16>
      %cst_24 = arith.constant dense<0.000000e+00> : vector<16x8xf32>
      %28 = tpu.matmul %26, %27, %cst_24 {dimension_numbers = #tpu.dot_dimension_numbers<[1], [0], [0], [1], [0, 0, 1, 1], [], []>} : vector<16x32xbf16>, vector<32x8xbf16>, vector<16x8xf32> -> vector<16x8xf32>
      %29 = arith.addf %25, %28 : vector<16x8xf32>
      %c0_25 = arith.constant 0 : index
      %c0_26 = arith.constant 0 : index
      %30 = vector.load %arg10[%c0_25, %c0_26] : memref<16x8xf32, #tpu.memory_space<vmem>>, vector<16x8xf32>
      tpu.vector_store %arg10[%c0_25, %c0_26], %29 {strides = array<i32>} : memref<16x8xf32, #tpu.memory_space<vmem>>, vector<16x8xf32>,
    } else {
    }
    %c0_i32_13 = arith.constant 0 : i32
    %17 = arith.cmpi eq, %arg1, %c0_i32_13 : i32
    %c0_i32_14 = arith.constant 0 : i32
    %18 = arith.cmpi eq, %arg2, %c0_i32_14 : i32
    %19 = arith.andi %17, %18 : i1
    %20 = arith.extui %19 : i1 to i32
    %c0_i32_15 = arith.constant 0 : i32
    %21 = arith.cmpi ne, %20, %c0_i32_15 : i32
    scf.if %21 {
      %c0_18 = arith.constant 0 : index
      %c0_19 = arith.constant 0 : index
      %25 = vector.load %arg10[%c0_18, %c0_19] : memref<16x8xf32, #tpu.memory_space<vmem>>, vector<16x8xf32>
      %26 = arith.truncf %25 : vector<16x8xf32> to vector<16x8xbf16>
      %c0_20 = arith.constant 0 : index
      %c0_21 = arith.constant 0 : index
      %27 = vector.load %arg11[%c0_20, %c0_21] : memref<16x8xbf16, #tpu.memory_space<vmem>>, vector<16x8xbf16>
      tpu.vector_store %arg11[%c0_20, %c0_21], %26 {strides = array<i32>} : memref<16x8xbf16, #tpu.memory_space<vmem>>, vector<16x8xbf16>,
    } else {
    }
    %c0_i32_16 = arith.constant 0 : i32
    %22 = arith.cmpi eq, %arg2, %c0_i32_16 : i32
    %23 = arith.extui %22 : i1 to i32
    %c0_i32_17 = arith.constant 0 : i32
    %24 = arith.cmpi ne, %23, %c0_i32_17 : i32
    scf.if %24 {
      %c0_18 = arith.constant 0 : index
      %c0_19 = arith.constant 0 : index
      %25 = vector.load %arg11[%c0_18, %c0_19] : memref<16x8xbf16, #tpu.memory_space<vmem>>, vector<16x8xbf16>
      %c0_20 = arith.constant 0 : index
      %c0_21 = arith.constant 0 : index
      %26 = vector.load %arg6[%c0_20, %c0_21] : memref<8x128xbf16, #tpu.memory_space<vmem>>, vector<8x128xbf16>
      %cst_22 = arith.constant dense<0.000000e+00> : vector<16x128xf32>
      %27 = tpu.matmul %25, %26, %cst_22 {dimension_numbers = #tpu.dot_dimension_numbers<[1], [0], [0], [1], [0, 0, 1, 1], [], []>} : vector<16x8xbf16>, vector<8x128xbf16>, vector<16x128xf32> -> vector<16x128xf32>
      %c0_23 = arith.constant 0 : index
      %c0_24 = arith.constant 0 : index
      %28 = vector.load %arg9[%c0_23, %c0_24] : memref<16x128xf32, #tpu.memory_space<vmem>>, vector<16x128xf32>
      %c0_25 = arith.constant 0 : index
      %c0_26 = arith.constant 0 : index
      %29 = vector.load %arg7[%c0_25, %c0_26] : memref<1x128xf32, #tpu.memory_space<vmem>>, vector<1x128xf32>
      %30 = vector.broadcast %29 : vector<1x128xf32> to vector<16x128xf32>
      %31 = arith.addf %28, %30 : vector<16x128xf32>
      %32 = arith.addf %31, %27 : vector<16x128xf32>
      %c0_27 = arith.constant 0 : index
      %c0_28 = arith.constant 0 : index
      %33 = vector.load %arg8[%c0_27, %c0_28] : memref<16x128xf32, #tpu.memory_space<vmem>>, vector<16x128xf32>
      tpu.vector_store %arg8[%c0_27, %c0_28], %32 {strides = array<i32>} : memref<16x128xf32, #tpu.memory_space<vmem>>, vector<16x128xf32>,
    } else {
    }
    return
  }
  func.func @transform_0(%arg0: i32, %arg1: i32, %arg2: i32) -> (i32, i32) {
    %c0_i32 = arith.constant 0 : i32
    return %arg0, %arg2 : i32, i32
  }
  func.func @transform_1(%arg0: i32, %arg1: i32, %arg2: i32) -> (i32, i32) {
    %c0_i32 = arith.constant 0 : i32
    return %arg2, %arg1 : i32, i32
  }
  func.func @transform_2(%arg0: i32, %arg1: i32, %arg2: i32) -> (i32, i32) {
    %c0_i32 = arith.constant 0 : i32
    %c0_i32_0 = arith.constant 0 : i32
    return %arg2, %c0_i32 : i32, i32
  }
  func.func @transform_3(%arg0: i32, %arg1: i32, %arg2: i32) -> (i32, i32) {
    %c0_i32 = arith.constant 0 : i32
    %c0_i32_0 = arith.constant 0 : i32
    return %c0_i32, %arg1 : i32, i32
  }
  func.func @transform_4(%arg0: i32, %arg1: i32, %arg2: i32) -> (i32, i32) {
    %c0_i32 = arith.constant 0 : i32
    %c0_i32_0 = arith.constant 0 : i32
    return %c0_i32, %arg1 : i32, i32
  }
  func.func @transform_5(%arg0: i32, %arg1: i32, %arg2: i32) -> (i32, i32) {
    %c0_i32 = arith.constant 0 : i32
    return %arg0, %arg1 : i32, i32
  }
}

</mosaic_0001>

<bundles_post_ra>
// kernel: tpu_custom_call.1
= control target key start
LH: loop header
LB: loop body
LE: loop exit
PB: predicated region body
PF: predicated region fallthrough
CT: control target
= control target key end

     0   :  { %10 = vsyncpa [#allocation6], 0  ;;  %s386_s0 = inlined_call_operand.hbm [shape: bf16[16,32], index: 0, kind: input, shape index: {}]   ;;  %s387_s1 = inlined_call_operand.vmem [shape: bf16[32,32], index: 1, kind: input, shape index: {}]   ;;  %s388_s2 = inlined_call_operand.vmem [shape: bf16[32,8], index: 2, kind: input, shape index: {}]   ;;  %s389_s3 = inlined_call_operand.vmem [shape: bf16[8,32], index: 3, kind: input, shape index: {}]   ;;  %s390_s4 = inlined_call_operand.vmem [shape: f32[1,32], index: 4, kind: input, shape index: {}]   ;;  %s391_s5 = inlined_call_operand.hbm [shape: f32[16,32], index: 5, kind: output, shape index: {}]  }
   0x1   :  { %11 = vsyncpa [#allocation7], 0  ;;  %s16_s20 = sshll.u32 %s386_s0, 4  ;;  %s320_s21 = smov [#allocation5]   ;;  %s17_s20 = int_to_ptr.hbm [resolvable:$true] %s16_s20 }
   0x2   :  { %s18_s22 = sshll.u32 %s320_s21, 4  ;;  %s321_s23 = smov 64   ;;  %s19_s22 = int_to_ptr.vmem [resolvable:$true] %s18_s22 }
   0x3   :  { %s322_s24 = smov 4  }
   0x4   :  { %24 = dma.hbm_to_vmem [thread:$0]  %s17_s20, 128, %s19_s22, [#allocation6], %s321_s23, %s321_s23, %s322_s24  }
   0x5   :  { %316 = dma.done.wait [#allocation6], 128  }
   0x6   :  { %317 = vsyncadd [#allocation6], 4294967168  ;;  %vm49_vm0 = vcmask 64512   ;;  %v323_v0 = vmov 0.0   ;;  %v258_v1 = vld [vmem:[%s388_s2 + $0x8] sm:$0xff]  ;;  %v257_v2 = vld [vmem:[%s388_s2] sm:$0xff] }
   0x7   :  { %50 = vst.msk [vmem:[#allocation3] sm:$0xff] %vm49_vm0, %v323_v0  ;;  %136 = vmatpush.bf16.msra.mxu1 %v258_v1  ;;  %v256_v3 = vld [vmem:[#allocation5] sm:$0xff]  ;;  %vm77_vm1 = vcmask 261120   ;;  %v255_v4 = vld [vmem:[%s387_s1 + $0x8] sm:$0xff]  ;;  %v254_v5 = vld [vmem:[%s387_s1] sm:$0xff]  ;;  %vm173_vm2 = vcmask 1043456  }
   0x8   :  { %51 = vst.msk [vmem:[#allocation3 + $0x8] sm:$0xff] %vm49_vm0, %v323_v0  ;;  %87 = vmatpush.bf16.msra.mxu0 %v255_v4  ;;  %v163_v6 = vld [vmem:[%s389_s3] sm:$0xf]  ;;  %v253_v8 = vld [vmem:[#allocation5] sm:$0xff]  ;;  %vm155_vm3 = vcmask 60416   ;;  %s324_s3 = smov [#allocation8]  }
   0x9   :  { %v175_v7 = vsel %vm173_vm2, %v163_v6, 0  ;;  %v267_v20 = vld [vmem:[%s390_s4] ss:$0 sm:$0xff]  ;;  %s207_s9 = sshll.u32 %s324_s3, 4  ;;  %s209_s12 = sshll.u32 %s391_s5, 4  ;;  %s208_s9 = int_to_ptr.vmem [resolvable:$true] %s207_s9  ;;  %s210_s12 = int_to_ptr.hbm [resolvable:$true] %s209_s12 }
   0xa   :  { %184 = vmatpush.bf16.msra.mxu2 %v175_v7  ;;  %s325_s13 = smov 128   ;;  %s326_s4 = smov 8  }
   0xb   :  { %137 = vmatpush.bf16.msra.mxu1 %v257_v2 }
   0xc   :  { %88 = vmatpush.bf16.msra.mxu0 %v254_v5 }
   0xe   :  { %247 = vmatmul.msk.bf16.vlgmr.msra.gmra.mxu1 %vm77_vm1, %v256_v3  ;;  %v102_v9 = vld [vmem:[#allocation3] sm:$0xff] }
   0xf   :  { %234 = vmatmul.msk.bf16.vlgmr.msra.gmra.mxu0 %vm77_vm1, %v253_v8  ;;  %v103_v12 = vld [vmem:[#allocation3 + $0x8] sm:$0xff] }
  0x8b   :  { %v139_v10 = vpop.f32.mrf.mxu1 }
  0x8c   :  { %v144_v11 = vadd.f32 %v139_v10, %v102_v9  ;;  %v90_v21 = vpop.f32.mrf.mxu0 }
  0x8d   :  { %v197_v22 = vadd.f32 %v267_v20, %v90_v21 }
  0x8e   :  { %147 = vst.msk [vmem:[#allocation3] sm:$0xff] %vm49_vm0, %v144_v11 }
  0x93   :  { %v141_v13 = vpop.f32.mrf.mxu1 }
  0x94   :  { %v145_v14 = vadd.f32 %v141_v13, %v103_v12  ;;  %v92_v25 = vpop.f32.mrf.mxu0 }
  0x95   :  { %v151_v15 = vld [vmem:[#allocation3] sm:$0xff]  ;;  %v198_v26 = vadd.f32 %v267_v20, %v92_v25 }
  0x96   :  { %v153_v16 = vpack.c.bf16 %v151_v15, %v151_v15  ;;  %148 = vst.msk [vmem:[#allocation3 + $0x8] sm:$0xff] %vm49_vm0, %v145_v14 }
  0x98   :  { %156 = vst.msk [vmem:[#allocation4] sm:$0xf] %vm155_vm3, %v153_v16 }
  0x9d   :  { %v152_v17 = vld [vmem:[#allocation3 + $0x8] sm:$0xff] }
  0x9e   :  { %v154_v18 = vpack.c.bf16 %v152_v17, %v152_v17 }
  0xa0   :  { %157 = vst.msk [vmem:[#allocation4 + $0x4] sm:$0xf] %vm155_vm3, %v154_v18 }
  0xa7   :  { %v259_v19 = vld [vmem:[#allocation4] sm:$0xff] }
  0xa8   :  { %252 = vmatmul.msk.bf16.vlgmr.msra.gmra.mxu2 %vm49_vm0, %v259_v19 }
 0x12b   :  { %v186_v23 = vpop.f32.mrf.mxu2 }
 0x12c   :  { %v199_v24 = vadd.f32 %v197_v22, %v186_v23 }
 0x12e   :  { %201 = vst [vmem:[#allocation8] sm:$0xff] %v199_v24 }
 0x133   :  { %v188_v27 = vpop.f32.mrf.mxu2 }
 0x134   :  { %v200_v28 = vadd.f32 %v198_v26, %v188_v27 }
 0x136   :  { %202 = vst [vmem:[#allocation8 + $0x8] sm:$0xff] %v200_v28 }
 0x137   :  { %215 = dma.vmem_to_hbm [thread:$0]  %s208_s9, 256, %s210_s12, [#allocation7], %s325_s13, %s325_s13, %s326_s4  }
 0x138   :  { %318 = dma.done.wait [#allocation7], 256  }
 0x139   :  { %319 = vsyncadd [#allocation7], 4294967040 }
 0x13a   :  { %220 = vsyncpa [#allocation6], 1 }
 0x13b   :  { %221 = vsyncpa [#allocation7], 1 }

</bundles_post_ra>
